<compile_context>
chip_gen: v5e
topology: v5e:2x2
jax: 0.10.0
libtpu: 0.0.40
codegen_flags: <defaults>
</compile_context>

<pallas_src>
import numpy as np
import jax
import jax.numpy as jnp
from jax.experimental import pallas as pl
from jax.experimental.pallas import tpu as pltpu


# ----------------------------- fused Pallas kernel --------------------------

def _make_kernel(H, W, C2, Cout):
    HW = H * W

    def _silu(y):
        # SiLU = y * sigmoid(y); 1/(1+e^t) via EUP exp + approx reciprocal
        # refined with one Newton step.  Clamp the exponent argument so that
        # exp never overflows for very negative y (otherwise inf * ~0 -> NaN
        # in the Newton step); for such y the result is ~0 anyway.
        d = 1.0 + jnp.exp(jnp.minimum(-y, 80.0))
        r = pl.reciprocal(d, approx=True)
        r = r * (2.0 - d * r)
        return y * r

    def kernel(x_ref, w1d_ref, b1d_ref, w2p1_ref, b2p1_ref,
               w2d_ref, b2d_ref, wf_ref, bf_ref, o_ref):
        # x_ref  : (Cin, HW)   one image, interior plane flattened onto lanes
        # w1d/b1d: (C2, 9)/(C2,1)  branch1 depthwise 3x3 (+folded BN)
        # w2p1/..: (C2, C2)/(C2,1) branch2 first 1x1 (+folded BN)
        # w2d/b2d: (C2, 9)/(C2,1)  branch2 depthwise 3x3 (+folded BN)
        # wf/bf  : (Cout, 2*C2)/(Cout,1)  both final 1x1 convs + concat +
        #          channel shuffle fused (even rows <- branch1, odd <- branch2)
        # o_ref  : (Cout, HW)

        # ---- per-tap validity masks (built once, shared by both branches) --
        pos = jax.lax.broadcasted_iota(jnp.int32, (1, HW), 1)
        if W & (W - 1) == 0:                      # power-of-two W: shift/and
            row = pos >> (W.bit_length() - 1)
            col = pos & (W - 1)
        else:                                     # generic fallback
            row = pos // W
            col = pos - row * W
        masks = {}
        for di in range(3):
            for dj in range(3):
                conds = []
                if di == 0:
                    conds.append(row >= 1)
                elif di == 2:
                    conds.append(row <= H - 2)
                if dj == 0:
                    conds.append(col >= 1)
                elif dj == 2:
                    conds.append(col <= W - 2)
                if conds:
                    m = conds[0]
                    for c in conds[1:]:
                        m = jnp.logical_and(m, c)
                    masks[(di, dj)] = m.astype(jnp.float32)
                else:
                    masks[(di, dj)] = None        # center tap: always valid

        def tap(src, di, dj):
            # src value at (h+di-1, w+dj-1) with zero padding, in flat form:
            # lane-roll the plane (XLU slot) and zero positions whose
            # neighbour falls outside the image.
            off = (di - 1) * W + (dj - 1)
            t = src if off == 0 else pltpu.roll(src, (-off) % HW, axis=1)
            m = masks[(di, dj)]
            return t if m is None else t * m

        def dw3x3(src, w_ref, b_ref):
            # depthwise 3x3, stride 1, pad 1 (+ folded BN), channel-vectorized:
            # src is a (C2, HW) block; weights broadcast as (C2, 1) columns.
            w = w_ref[...]
            acc = jnp.broadcast_to(b_ref[...], src.shape)
            for di in range(3):
                for dj in range(3):
                    t = 3 * di + dj
                    acc = acc + w[:, t:t + 1] * tap(src, di, dj)
            return acc

        def pw(src, w_ref, b_ref):
            # 1x1 conv (+ folded BN): broadcast-MAC over input channels
            # (2..4 channels -> MXU would be <1% utilized, keep it on the VPU).
            w = w_ref[...]
            n_out, n_in = w.shape
            acc = jnp.broadcast_to(b_ref[...], (n_out, HW))
            for i in range(n_in):
                acc = acc + w[:, i:i + 1] * src[i:i + 1, :]
            return acc

        x1 = x_ref[:C2, :]                      # (C2, HW) branch-1 input
        x2 = x_ref[C2:, :]                      # (C2, HW) branch-2 input

        # ---- branch 1: dw3x3 + BN ------------------------------------------
        h1 = dw3x3(x1, w1d_ref, b1d_ref)
        # ---- branch 2: 1x1+BN+SiLU -> dw3x3+BN (all in registers) ----------
        a2 = _silu(pw(x2, w2p1_ref, b2p1_ref))
        h2 = dw3x3(a2, w2d_ref, b2d_ref)

        # ---- fused final 1x1 convs + concat + ChannelShuffle(2) + SiLU ------
        wf = wf_ref[...]
        acc = jnp.broadcast_to(bf_ref[...], (Cout, HW))
        for i in range(C2):
            acc = acc + wf[:, i:i + 1] * h1[i:i + 1, :]
        for i in range(C2):
            acc = acc + wf[:, C2 + i:C2 + i + 1] * h2[i:i + 1, :]
        o_ref[...] = _silu(acc)                 # single lane-dense block store

    return kernel


# ------------------------------ wrapper / glue -------------------------------

def _fold_bn(conv_bias, bn, eps=1e-5):
    s = bn['gamma'] / jnp.sqrt(bn['var'] + eps)
    return s, (conv_bias - bn['mean']) * s + bn['beta']


def residual_bottleneck_pallas(x_nchw, P):
    N, Cin, H, W = x_nchw.shape
    C2 = Cin // 2
    Co2 = P['b1_pw_w'].shape[0]
    Cout = 2 * Co2
    HW = H * W

    # Only host-side activation op: a free (bitcast) reshape to (N, Cin, H*W).
    x = x_nchw.astype(jnp.float32).reshape(N, Cin, HW)

    # Fold inference-mode BatchNorm into conv weights / biases (params only).
    s, b1d = _fold_bn(P['b1_dw_b'], P['b1_bn1'])
    w1d = P['b1_dw_w'].reshape(C2, 9) * s[:, None]             # (C2, 9)
    s, b1p = _fold_bn(P['b1_pw_b'], P['b1_bn2'])
    w1p = P['b1_pw_w'] * s[:, None]                            # (Co2, C2)
    s, b2p1 = _fold_bn(P['b2_pw1_b'], P['b2_bn1'])
    w2p1 = P['b2_pw1_w'] * s[:, None]                          # (C2, C2)
    s, b2d = _fold_bn(P['b2_dw_b'], P['b2_bn2'])
    w2d = P['b2_dw_w'].reshape(C2, 9) * s[:, None]             # (C2, 9)
    s, b2p2 = _fold_bn(P['b2_pw2_b'], P['b2_bn3'])
    w2p2 = P['b2_pw2_w'] * s[:, None]                          # (Co2, C2)

    # Fuse concat + ChannelShuffle(groups=2) + both final 1x1 convs into one
    # (Cout, 2*C2) weight: even output rows take branch1, odd rows branch2.
    wf = jnp.zeros((Cout, 2 * C2), jnp.float32)
    wf = wf.at[0::2, :C2].set(w1p).at[1::2, C2:].set(w2p2)
    bf = jnp.zeros((Cout,), jnp.float32).at[0::2].set(b1p).at[1::2].set(b2p2)

    wspec = lambda shape: pl.BlockSpec(shape, lambda n: (0, 0))
    out = pl.pallas_call(
        _make_kernel(H, W, C2, Cout),
        out_shape=jax.ShapeDtypeStruct((N, Cout, HW), jnp.float32),
        grid=(N,),
        in_specs=[
            pl.BlockSpec((None, Cin, HW), lambda n: (n, 0, 0)),  # one image/step
            wspec((C2, 9)), wspec((C2, 1)),          # branch1 dw (+BN)
            wspec((C2, C2)), wspec((C2, 1)),         # branch2 pw1 (+BN)
            wspec((C2, 9)), wspec((C2, 1)),          # branch2 dw (+BN)
            wspec((Cout, 2 * C2)), wspec((Cout, 1)),  # fused final pw + shuffle
        ],
        out_specs=pl.BlockSpec((None, Cout, HW), lambda n: (n, 0, 0)),
        compiler_params=pltpu.CompilerParams(
            dimension_semantics=("parallel",)),
    )(x, w1d, b1d.reshape(C2, 1), w2p1, b2p1.reshape(C2, 1),
      w2d, b2d.reshape(C2, 1), wf, bf.reshape(Cout, 1))

    return out.reshape(N, Cout, H, W)            # free reshape, no crop


# ------------------------------- parameters ---------------------------------

def init_params(key, cin, cout):
    c2, co2 = cin // 2, cout // 2
    keys = iter(jax.random.split(key, 40))

    def conv_w(shape):
        return (0.2 * jax.random.normal(next(keys), shape)).astype(jnp.float32)

    def conv_b(c):
        return (0.1 * jax.random.normal(next(keys), (c,))).astype(jnp.float32)

    def bn(c):
        return dict(
            gamma=(1.0 + 0.1 * jax.random.normal(next(keys), (c,))).astype(jnp.float32),
            beta=(0.1 * jax.random.normal(next(keys), (c,))).astype(jnp.float32),
            mean=(0.1 * jax.random.normal(next(keys), (c,))).astype(jnp.float32),
            var=jax.random.uniform(next(keys), (c,), minval=0.5, maxval=1.5).astype(jnp.float32),
        )

    return dict(
        b1_dw_w=conv_w((c2, 3, 3)), b1_dw_b=conv_b(c2), b1_bn1=bn(c2),
        b1_pw_w=conv_w((co2, c2)), b1_pw_b=conv_b(co2), b1_bn2=bn(co2),
        b2_pw1_w=conv_w((c2, c2)), b2_pw1_b=conv_b(c2), b2_bn1=bn(c2),
        b2_dw_w=conv_w((c2, 3, 3)), b2_dw_b=conv_b(c2), b2_bn2=bn(c2),
        b2_pw2_w=conv_w((co2, c2)), b2_pw2_b=conv_b(co2), b2_bn3=bn(co2),
    )


# ---------------------------- pure-JAX reference ----------------------------

def residual_bottleneck_ref(x, P):
    eps = 1e-5
    sh = lambda v: v.reshape(1, -1, 1, 1)

    def bn(y, d):
        return (y - sh(d['mean'])) / jnp.sqrt(sh(d['var']) + eps) * sh(d['gamma']) + sh(d['beta'])

    def dw(y, w, b):
        C = y.shape[1]
        z = jax.lax.conv_general_dilated(
            y, w.reshape(C, 1, 3, 3), (1, 1), ((1, 1), (1, 1)),
            dimension_numbers=('NCHW', 'OIHW', 'NCHW'), feature_group_count=C)
        return z + sh(b)

    def pw(y, w, b):
        return jnp.einsum('nchw,oc->nohw', y, w) + sh(b)

    silu = lambda z: z * jax.nn.sigmoid(z)

    x1, x2 = jnp.split(x, 2, axis=1)
    y1 = bn(dw(x1, P['b1_dw_w'], P['b1_dw_b']), P['b1_bn1'])
    y1 = silu(bn(pw(y1, P['b1_pw_w'], P['b1_pw_b']), P['b1_bn2']))
    y2 = silu(bn(pw(x2, P['b2_pw1_w'], P['b2_pw1_b']), P['b2_bn1']))
    y2 = bn(dw(y2, P['b2_dw_w'], P['b2_dw_b']), P['b2_bn2'])
    y2 = silu(bn(pw(y2, P['b2_pw2_w'], P['b2_pw2_b']), P['b2_bn3']))
    y = jnp.concatenate([y1, y2], axis=1)
    n, c, h, w = y.shape
    return y.reshape(n, 2, c // 2, h, w).transpose(0, 2, 1, 3, 4).reshape(n, c, h, w)


# ----------------------------------- main ------------------------------------

if __name__ == "__main__":
    key = jax.random.PRNGKey(0)
    kx, kp = jax.random.split(key)

    N, Cin, Cout, H, W = 2, 4, 8, 16, 16
    x = jax.random.normal(kx, (N, Cin, H, W), jnp.float32)
    P = init_params(kp, Cin, Cout)

    out = jax.block_until_ready(jax.jit(residual_bottleneck_pallas)(x, P))
    ref = jax.block_until_ready(residual_bottleneck_ref(x, P))

    assert out.shape == (N, Cout, H, W), out.shape
    # Tolerance 5e-4: the only deviation from the f32 reference is the
    # EUP approx-reciprocal (+1 Newton step) used inside SiLU.
    np.testing.assert_allclose(np.asarray(out), np.asarray(ref), rtol=5e-4, atol=5e-4)
    print("KERNEL_OK")
</pallas_src>

<mosaic_0001>
module attributes {stable_mosaic.version = 11 : i64} {
  func.func @kernel(%arg0: i32, %arg1: memref<1x4x256xf32, #tpu.memory_space<vmem>>, %arg2: memref<2x9xf32, #tpu.memory_space<vmem>>, %arg3: memref<2x1xf32, #tpu.memory_space<vmem>>, %arg4: memref<2x2xf32, #tpu.memory_space<vmem>>, %arg5: memref<2x1xf32, #tpu.memory_space<vmem>>, %arg6: memref<2x9xf32, #tpu.memory_space<vmem>>, %arg7: memref<2x1xf32, #tpu.memory_space<vmem>>, %arg8: memref<8x4xf32, #tpu.memory_space<vmem>>, %arg9: memref<8x1xf32, #tpu.memory_space<vmem>>, %arg10: memref<1x8x256xf32, #tpu.memory_space<vmem>>) attributes {dimension_semantics = [#tpu.dimension_semantics<parallel>], iteration_bounds = array<i64: 2>, scalar_prefetch = 0 : i64, scratch_operands = 0 : i64, tpu.core_type = #tpu.core_type<tc>, window_params = [{transform_indices = @transform_0, window_bounds = array<i64: 1, 4, 256>}, {pipeline_mode = #tpu.pipeline_mode<synchronous>, transform_indices = @transform_1, window_bounds = array<i64: 2, 9>}, {pipeline_mode = #tpu.pipeline_mode<synchronous>, transform_indices = @transform_2, window_bounds = array<i64: 2, 1>}, {pipeline_mode = #tpu.pipeline_mode<synchronous>, transform_indices = @transform_3, window_bounds = array<i64: 2, 2>}, {pipeline_mode = #tpu.pipeline_mode<synchronous>, transform_indices = @transform_4, window_bounds = array<i64: 2, 1>}, {pipeline_mode = #tpu.pipeline_mode<synchronous>, transform_indices = @transform_5, window_bounds = array<i64: 2, 9>}, {pipeline_mode = #tpu.pipeline_mode<synchronous>, transform_indices = @transform_6, window_bounds = array<i64: 2, 1>}, {pipeline_mode = #tpu.pipeline_mode<synchronous>, transform_indices = @transform_7, window_bounds = array<i64: 8, 4>}, {pipeline_mode = #tpu.pipeline_mode<synchronous>, transform_indices = @transform_8, window_bounds = array<i64: 8, 1>}, {transform_indices = @transform_9, window_bounds = array<i64: 1, 8, 256>}]} {
    %0 = tpu.iota {dimensions = array<i32: 1>} : vector<1x256xi32>
    %c4_i32 = arith.constant 4 : i32
    %1 = vector.broadcast %c4_i32 : i32 to vector<1x256xi32>
    %2 = arith.shrsi %0, %1 : vector<1x256xi32>
    %c15_i32 = arith.constant 15 : i32
    %3 = vector.broadcast %c15_i32 : i32 to vector<1x256xi32>
    %4 = arith.andi %0, %3 : vector<1x256xi32>
    %c1_i32 = arith.constant 1 : i32
    %5 = vector.broadcast %c1_i32 : i32 to vector<1x256xi32>
    %6 = arith.cmpi sge, %2, %5 : vector<1x256xi32>
    %c1_i32_0 = arith.constant 1 : i32
    %7 = vector.broadcast %c1_i32_0 : i32 to vector<1x256xi32>
    %8 = arith.cmpi sge, %4, %7 : vector<1x256xi32>
    %9 = arith.andi %6, %8 : vector<1x256xi1>
    %10 = arith.extui %9 : vector<1x256xi1> to vector<1x256xi32>
    %11 = arith.sitofp %10 : vector<1x256xi32> to vector<1x256xf32>
    %c1_i32_1 = arith.constant 1 : i32
    %12 = vector.broadcast %c1_i32_1 : i32 to vector<1x256xi32>
    %13 = arith.cmpi sge, %2, %12 : vector<1x256xi32>
    %14 = arith.extui %13 : vector<1x256xi1> to vector<1x256xi32>
    %15 = arith.sitofp %14 : vector<1x256xi32> to vector<1x256xf32>
    %c1_i32_2 = arith.constant 1 : i32
    %16 = vector.broadcast %c1_i32_2 : i32 to vector<1x256xi32>
    %17 = arith.cmpi sge, %2, %16 : vector<1x256xi32>
    %c14_i32 = arith.constant 14 : i32
    %18 = vector.broadcast %c14_i32 : i32 to vector<1x256xi32>
    %19 = arith.cmpi sle, %4, %18 : vector<1x256xi32>
    %20 = arith.andi %17, %19 : vector<1x256xi1>
    %21 = arith.extui %20 : vector<1x256xi1> to vector<1x256xi32>
    %22 = arith.sitofp %21 : vector<1x256xi32> to vector<1x256xf32>
    %c1_i32_3 = arith.constant 1 : i32
    %23 = vector.broadcast %c1_i32_3 : i32 to vector<1x256xi32>
    %24 = arith.cmpi sge, %4, %23 : vector<1x256xi32>
    %25 = arith.extui %24 : vector<1x256xi1> to vector<1x256xi32>
    %26 = arith.sitofp %25 : vector<1x256xi32> to vector<1x256xf32>
    %c14_i32_4 = arith.constant 14 : i32
    %27 = vector.broadcast %c14_i32_4 : i32 to vector<1x256xi32>
    %28 = arith.cmpi sle, %4, %27 : vector<1x256xi32>
    %29 = arith.extui %28 : vector<1x256xi1> to vector<1x256xi32>
    %30 = arith.sitofp %29 : vector<1x256xi32> to vector<1x256xf32>
    %c14_i32_5 = arith.constant 14 : i32
    %31 = vector.broadcast %c14_i32_5 : i32 to vector<1x256xi32>
    %32 = arith.cmpi sle, %2, %31 : vector<1x256xi32>
    %c1_i32_6 = arith.constant 1 : i32
    %33 = vector.broadcast %c1_i32_6 : i32 to vector<1x256xi32>
    %34 = arith.cmpi sge, %4, %33 : vector<1x256xi32>
    %35 = arith.andi %32, %34 : vector<1x256xi1>
    %36 = arith.extui %35 : vector<1x256xi1> to vector<1x256xi32>
    %37 = arith.sitofp %36 : vector<1x256xi32> to vector<1x256xf32>
    %c14_i32_7 = arith.constant 14 : i32
    %38 = vector.broadcast %c14_i32_7 : i32 to vector<1x256xi32>
    %39 = arith.cmpi sle, %2, %38 : vector<1x256xi32>
    %40 = arith.extui %39 : vector<1x256xi1> to vector<1x256xi32>
    %41 = arith.sitofp %40 : vector<1x256xi32> to vector<1x256xf32>
    %c14_i32_8 = arith.constant 14 : i32
    %42 = vector.broadcast %c14_i32_8 : i32 to vector<1x256xi32>
    %43 = arith.cmpi sle, %2, %42 : vector<1x256xi32>
    %c14_i32_9 = arith.constant 14 : i32
    %44 = vector.broadcast %c14_i32_9 : i32 to vector<1x256xi32>
    %45 = arith.cmpi sle, %4, %44 : vector<1x256xi32>
    %46 = arith.andi %43, %45 : vector<1x256xi1>
    %47 = arith.extui %46 : vector<1x256xi1> to vector<1x256xi32>
    %48 = arith.sitofp %47 : vector<1x256xi32> to vector<1x256xf32>
    %c0 = arith.constant 0 : index
    %c0_10 = arith.constant 0 : index
    %c0_11 = arith.constant 0 : index
    %49 = vector.load %arg1[%c0, %c0_10, %c0_11] : memref<1x4x256xf32, #tpu.memory_space<vmem>>, vector<1x2x256xf32>
    %50 = vector.shape_cast %49 : vector<1x2x256xf32> to vector<2x256xf32>
    %c0_12 = arith.constant 0 : index
    %c2 = arith.constant 2 : index
    %c0_13 = arith.constant 0 : index
    %51 = vector.load %arg1[%c0_12, %c2, %c0_13] : memref<1x4x256xf32, #tpu.memory_space<vmem>>, vector<1x2x256xf32>
    %52 = vector.shape_cast %51 : vector<1x2x256xf32> to vector<2x256xf32>
    %c0_14 = arith.constant 0 : index
    %c0_15 = arith.constant 0 : index
    %53 = vector.load %arg2[%c0_14, %c0_15] : memref<2x9xf32, #tpu.memory_space<vmem>>, vector<2x9xf32>
    %c0_16 = arith.constant 0 : index
    %c0_17 = arith.constant 0 : index
    %54 = vector.load %arg3[%c0_16, %c0_17] : memref<2x1xf32, #tpu.memory_space<vmem>>, vector<2x1xf32>
    %55 = vector.shape_cast %54 : vector<2x1xf32> to vector<2x1xf32>
    %56 = vector.broadcast %55 : vector<2x1xf32> to vector<2x256xf32>
    %57 = vector.extract_strided_slice %53 {offsets = [0, 0], sizes = [2, 1], strides = [1, 1]} : vector<2x9xf32> to vector<2x1xf32>
    %c17_i32 = arith.constant 17 : i32
    %58 = tpu.dynamic_rotate %50 by %c17_i32 dim 1 : vector<2x256xf32>, i32 -> vector<2x256xf32>
    %59 = vector.broadcast %11 : vector<1x256xf32> to vector<2x256xf32>
    %60 = arith.mulf %58, %59 : vector<2x256xf32>
    %61 = vector.broadcast %57 : vector<2x1xf32> to vector<2x256xf32>
    %62 = arith.mulf %61, %60 : vector<2x256xf32>
    %63 = arith.addf %56, %62 : vector<2x256xf32>
    %64 = vector.extract_strided_slice %53 {offsets = [0, 1], sizes = [2, 1], strides = [1, 1]} : vector<2x9xf32> to vector<2x1xf32>
    %c16_i32 = arith.constant 16 : i32
    %65 = tpu.dynamic_rotate %50 by %c16_i32 dim 1 : vector<2x256xf32>, i32 -> vector<2x256xf32>
    %66 = vector.broadcast %15 : vector<1x256xf32> to vector<2x256xf32>
    %67 = arith.mulf %65, %66 : vector<2x256xf32>
    %68 = vector.broadcast %64 : vector<2x1xf32> to vector<2x256xf32>
    %69 = arith.mulf %68, %67 : vector<2x256xf32>
    %70 = arith.addf %63, %69 : vector<2x256xf32>
    %71 = vector.extract_strided_slice %53 {offsets = [0, 2], sizes = [2, 1], strides = [1, 1]} : vector<2x9xf32> to vector<2x1xf32>
    %c15_i32_18 = arith.constant 15 : i32
    %72 = tpu.dynamic_rotate %50 by %c15_i32_18 dim 1 : vector<2x256xf32>, i32 -> vector<2x256xf32>
    %73 = vector.broadcast %22 : vector<1x256xf32> to vector<2x256xf32>
    %74 = arith.mulf %72, %73 : vector<2x256xf32>
    %75 = vector.broadcast %71 : vector<2x1xf32> to vector<2x256xf32>
    %76 = arith.mulf %75, %74 : vector<2x256xf32>
    %77 = arith.addf %70, %76 : vector<2x256xf32>
    %78 = vector.extract_strided_slice %53 {offsets = [0, 3], sizes = [2, 1], strides = [1, 1]} : vector<2x9xf32> to vector<2x1xf32>
    %c1_i32_19 = arith.constant 1 : i32
    %79 = tpu.dynamic_rotate %50 by %c1_i32_19 dim 1 : vector<2x256xf32>, i32 -> vector<2x256xf32>
    %80 = vector.broadcast %26 : vector<1x256xf32> to vector<2x256xf32>
    %81 = arith.mulf %79, %80 : vector<2x256xf32>
    %82 = vector.broadcast %78 : vector<2x1xf32> to vector<2x256xf32>
    %83 = arith.mulf %82, %81 : vector<2x256xf32>
    %84 = arith.addf %77, %83 : vector<2x256xf32>
    %85 = vector.extract_strided_slice %53 {offsets = [0, 4], sizes = [2, 1], strides = [1, 1]} : vector<2x9xf32> to vector<2x1xf32>
    %86 = vector.broadcast %85 : vector<2x1xf32> to vector<2x256xf32>
    %87 = arith.mulf %86, %50 : vector<2x256xf32>
    %88 = arith.addf %84, %87 : vector<2x256xf32>
    %89 = vector.extract_strided_slice %53 {offsets = [0, 5], sizes = [2, 1], strides = [1, 1]} : vector<2x9xf32> to vector<2x1xf32>
    %c255_i32 = arith.constant 255 : i32
    %90 = tpu.dynamic_rotate %50 by %c255_i32 dim 1 : vector<2x256xf32>, i32 -> vector<2x256xf32>
    %91 = vector.broadcast %30 : vector<1x256xf32> to vector<2x256xf32>
    %92 = arith.mulf %90, %91 : vector<2x256xf32>
    %93 = vector.broadcast %89 : vector<2x1xf32> to vector<2x256xf32>
    %94 = arith.mulf %93, %92 : vector<2x256xf32>
    %95 = arith.addf %88, %94 : vector<2x256xf32>
    %96 = vector.extract_strided_slice %53 {offsets = [0, 6], sizes = [2, 1], strides = [1, 1]} : vector<2x9xf32> to vector<2x1xf32>
    %c241_i32 = arith.constant 241 : i32
    %97 = tpu.dynamic_rotate %50 by %c241_i32 dim 1 : vector<2x256xf32>, i32 -> vector<2x256xf32>
    %98 = vector.broadcast %37 : vector<1x256xf32> to vector<2x256xf32>
    %99 = arith.mulf %97, %98 : vector<2x256xf32>
    %100 = vector.broadcast %96 : vector<2x1xf32> to vector<2x256xf32>
    %101 = arith.mulf %100, %99 : vector<2x256xf32>
    %102 = arith.addf %95, %101 : vector<2x256xf32>
    %103 = vector.extract_strided_slice %53 {offsets = [0, 7], sizes = [2, 1], strides = [1, 1]} : vector<2x9xf32> to vector<2x1xf32>
    %c240_i32 = arith.constant 240 : i32
    %104 = tpu.dynamic_rotate %50 by %c240_i32 dim 1 : vector<2x256xf32>, i32 -> vector<2x256xf32>
    %105 = vector.broadcast %41 : vector<1x256xf32> to vector<2x256xf32>
    %106 = arith.mulf %104, %105 : vector<2x256xf32>
    %107 = vector.broadcast %103 : vector<2x1xf32> to vector<2x256xf32>
    %108 = arith.mulf %107, %106 : vector<2x256xf32>
    %109 = arith.addf %102, %108 : vector<2x256xf32>
    %110 = vector.extract_strided_slice %53 {offsets = [0, 8], sizes = [2, 1], strides = [1, 1]} : vector<2x9xf32> to vector<2x1xf32>
    %c239_i32 = arith.constant 239 : i32
    %111 = tpu.dynamic_rotate %50 by %c239_i32 dim 1 : vector<2x256xf32>, i32 -> vector<2x256xf32>
    %112 = vector.broadcast %48 : vector<1x256xf32> to vector<2x256xf32>
    %113 = arith.mulf %111, %112 : vector<2x256xf32>
    %114 = vector.broadcast %110 : vector<2x1xf32> to vector<2x256xf32>
    %115 = arith.mulf %114, %113 : vector<2x256xf32>
    %116 = arith.addf %109, %115 : vector<2x256xf32>
    %c0_20 = arith.constant 0 : index
    %c0_21 = arith.constant 0 : index
    %117 = vector.load %arg4[%c0_20, %c0_21] : memref<2x2xf32, #tpu.memory_space<vmem>>, vector<2x2xf32>
    %c0_22 = arith.constant 0 : index
    %c0_23 = arith.constant 0 : index
    %118 = vector.load %arg5[%c0_22, %c0_23] : memref<2x1xf32, #tpu.memory_space<vmem>>, vector<2x1xf32>
    %119 = vector.shape_cast %118 : vector<2x1xf32> to vector<2x1xf32>
    %120 = vector.broadcast %119 : vector<2x1xf32> to vector<2x256xf32>
    %121 = vector.extract_strided_slice %117 {offsets = [0, 0], sizes = [2, 1], strides = [1, 1]} : vector<2x2xf32> to vector<2x1xf32>
    %122 = vector.extract_strided_slice %52 {offsets = [0, 0], sizes = [1, 256], strides = [1, 1]} : vector<2x256xf32> to vector<1x256xf32>
    %123 = vector.broadcast %121 : vector<2x1xf32> to vector<2x256xf32>
    %124 = vector.broadcast %122 : vector<1x256xf32> to vector<2x256xf32>
    %125 = arith.mulf %123, %124 : vector<2x256xf32>
    %126 = arith.addf %120, %125 : vector<2x256xf32>
    %127 = vector.extract_strided_slice %117 {offsets = [0, 1], sizes = [2, 1], strides = [1, 1]} : vector<2x2xf32> to vector<2x1xf32>
    %128 = vector.extract_strided_slice %52 {offsets = [1, 0], sizes = [1, 256], strides = [1, 1]} : vector<2x256xf32> to vector<1x256xf32>
    %129 = vector.broadcast %127 : vector<2x1xf32> to vector<2x256xf32>
    %130 = vector.broadcast %128 : vector<1x256xf32> to vector<2x256xf32>
    %131 = arith.mulf %129, %130 : vector<2x256xf32>
    %132 = arith.addf %126, %131 : vector<2x256xf32>
    %cst = arith.constant 0.000000e+00 : f32
    %133 = vector.broadcast %cst : f32 to vector<2x256xf32>
    %134 = arith.subf %133, %132 : vector<2x256xf32>
    %cst_24 = arith.constant 8.000000e+01 : f32
    %135 = vector.broadcast %cst_24 : f32 to vector<2x256xf32>
    %136 = arith.minimumf %134, %135 : vector<2x256xf32>
    %137 = math.exp %136 : vector<2x256xf32>
    %cst_25 = arith.constant 1.000000e+00 : f32
    %138 = vector.broadcast %cst_25 : f32 to vector<2x256xf32>
    %139 = arith.addf %138, %137 : vector<2x256xf32>
    %140 = tpu.reciprocal %139 {approx = true} : vector<2x256xf32> -> vector<2x256xf32>
    %141 = arith.mulf %139, %140 : vector<2x256xf32>
    %cst_26 = arith.constant 2.000000e+00 : f32
    %142 = vector.broadcast %cst_26 : f32 to vector<2x256xf32>
    %143 = arith.subf %142, %141 : vector<2x256xf32>
    %144 = arith.mulf %140, %143 : vector<2x256xf32>
    %145 = arith.mulf %132, %144 : vector<2x256xf32>
    %c0_27 = arith.constant 0 : index
    %c0_28 = arith.constant 0 : index
    %146 = vector.load %arg6[%c0_27, %c0_28] : memref<2x9xf32, #tpu.memory_space<vmem>>, vector<2x9xf32>
    %c0_29 = arith.constant 0 : index
    %c0_30 = arith.constant 0 : index
    %147 = vector.load %arg7[%c0_29, %c0_30] : memref<2x1xf32, #tpu.memory_space<vmem>>, vector<2x1xf32>
    %148 = vector.shape_cast %147 : vector<2x1xf32> to vector<2x1xf32>
    %149 = vector.broadcast %148 : vector<2x1xf32> to vector<2x256xf32>
    %150 = vector.extract_strided_slice %146 {offsets = [0, 0], sizes = [2, 1], strides = [1, 1]} : vector<2x9xf32> to vector<2x1xf32>
    %c17_i32_31 = arith.constant 17 : i32
    %151 = tpu.dynamic_rotate %145 by %c17_i32_31 dim 1 : vector<2x256xf32>, i32 -> vector<2x256xf32>
    %152 = vector.broadcast %11 : vector<1x256xf32> to vector<2x256xf32>
    %153 = arith.mulf %151, %152 : vector<2x256xf32>
    %154 = vector.broadcast %150 : vector<2x1xf32> to vector<2x256xf32>
    %155 = arith.mulf %154, %153 : vector<2x256xf32>
    %156 = arith.addf %149, %155 : vector<2x256xf32>
    %157 = vector.extract_strided_slice %146 {offsets = [0, 1], sizes = [2, 1], strides = [1, 1]} : vector<2x9xf32> to vector<2x1xf32>
    %c16_i32_32 = arith.constant 16 : i32
    %158 = tpu.dynamic_rotate %145 by %c16_i32_32 dim 1 : vector<2x256xf32>, i32 -> vector<2x256xf32>
    %159 = vector.broadcast %15 : vector<1x256xf32> to vector<2x256xf32>
    %160 = arith.mulf %158, %159 : vector<2x256xf32>
    %161 = vector.broadcast %157 : vector<2x1xf32> to vector<2x256xf32>
    %162 = arith.mulf %161, %160 : vector<2x256xf32>
    %163 = arith.addf %156, %162 : vector<2x256xf32>
    %164 = vector.extract_strided_slice %146 {offsets = [0, 2], sizes = [2, 1], strides = [1, 1]} : vector<2x9xf32> to vector<2x1xf32>
    %c15_i32_33 = arith.constant 15 : i32
    %165 = tpu.dynamic_rotate %145 by %c15_i32_33 dim 1 : vector<2x256xf32>, i32 -> vector<2x256xf32>
    %166 = vector.broadcast %22 : vector<1x256xf32> to vector<2x256xf32>
    %167 = arith.mulf %165, %166 : vector<2x256xf32>
    %168 = vector.broadcast %164 : vector<2x1xf32> to vector<2x256xf32>
    %169 = arith.mulf %168, %167 : vector<2x256xf32>
    %170 = arith.addf %163, %169 : vector<2x256xf32>
    %171 = vector.extract_strided_slice %146 {offsets = [0, 3], sizes = [2, 1], strides = [1, 1]} : vector<2x9xf32> to vector<2x1xf32>
    %c1_i32_34 = arith.constant 1 : i32
    %172 = tpu.dynamic_rotate %145 by %c1_i32_34 dim 1 : vector<2x256xf32>, i32 -> vector<2x256xf32>
    %173 = vector.broadcast %26 : vector<1x256xf32> to vector<2x256xf32>
    %174 = arith.mulf %172, %173 : vector<2x256xf32>
    %175 = vector.broadcast %171 : vector<2x1xf32> to vector<2x256xf32>
    %176 = arith.mulf %175, %174 : vector<2x256xf32>
    %177 = arith.addf %170, %176 : vector<2x256xf32>
    %178 = vector.extract_strided_slice %146 {offsets = [0, 4], sizes = [2, 1], strides = [1, 1]} : vector<2x9xf32> to vector<2x1xf32>
    %179 = vector.broadcast %178 : vector<2x1xf32> to vector<2x256xf32>
    %180 = arith.mulf %179, %145 : vector<2x256xf32>
    %181 = arith.addf %177, %180 : vector<2x256xf32>
    %182 = vector.extract_strided_slice %146 {offsets = [0, 5], sizes = [2, 1], strides = [1, 1]} : vector<2x9xf32> to vector<2x1xf32>
    %c255_i32_35 = arith.constant 255 : i32
    %183 = tpu.dynamic_rotate %145 by %c255_i32_35 dim 1 : vector<2x256xf32>, i32 -> vector<2x256xf32>
    %184 = vector.broadcast %30 : vector<1x256xf32> to vector<2x256xf32>
    %185 = arith.mulf %183, %184 : vector<2x256xf32>
    %186 = vector.broadcast %182 : vector<2x1xf32> to vector<2x256xf32>
    %187 = arith.mulf %186, %185 : vector<2x256xf32>
    %188 = arith.addf %181, %187 : vector<2x256xf32>
    %189 = vector.extract_strided_slice %146 {offsets = [0, 6], sizes = [2, 1], strides = [1, 1]} : vector<2x9xf32> to vector<2x1xf32>
    %c241_i32_36 = arith.constant 241 : i32
    %190 = tpu.dynamic_rotate %145 by %c241_i32_36 dim 1 : vector<2x256xf32>, i32 -> vector<2x256xf32>
    %191 = vector.broadcast %37 : vector<1x256xf32> to vector<2x256xf32>
    %192 = arith.mulf %190, %191 : vector<2x256xf32>
    %193 = vector.broadcast %189 : vector<2x1xf32> to vector<2x256xf32>
    %194 = arith.mulf %193, %192 : vector<2x256xf32>
    %195 = arith.addf %188, %194 : vector<2x256xf32>
    %196 = vector.extract_strided_slice %146 {offsets = [0, 7], sizes = [2, 1], strides = [1, 1]} : vector<2x9xf32> to vector<2x1xf32>
    %c240_i32_37 = arith.constant 240 : i32
    %197 = tpu.dynamic_rotate %145 by %c240_i32_37 dim 1 : vector<2x256xf32>, i32 -> vector<2x256xf32>
    %198 = vector.broadcast %41 : vector<1x256xf32> to vector<2x256xf32>
    %199 = arith.mulf %197, %198 : vector<2x256xf32>
    %200 = vector.broadcast %196 : vector<2x1xf32> to vector<2x256xf32>
    %201 = arith.mulf %200, %199 : vector<2x256xf32>
    %202 = arith.addf %195, %201 : vector<2x256xf32>
    %203 = vector.extract_strided_slice %146 {offsets = [0, 8], sizes = [2, 1], strides = [1, 1]} : vector<2x9xf32> to vector<2x1xf32>
    %c239_i32_38 = arith.constant 239 : i32
    %204 = tpu.dynamic_rotate %145 by %c239_i32_38 dim 1 : vector<2x256xf32>, i32 -> vector<2x256xf32>
    %205 = vector.broadcast %48 : vector<1x256xf32> to vector<2x256xf32>
    %206 = arith.mulf %204, %205 : vector<2x256xf32>
    %207 = vector.broadcast %203 : vector<2x1xf32> to vector<2x256xf32>
    %208 = arith.mulf %207, %206 : vector<2x256xf32>
    %209 = arith.addf %202, %208 : vector<2x256xf32>
    %c0_39 = arith.constant 0 : index
    %c0_40 = arith.constant 0 : index
    %210 = vector.load %arg8[%c0_39, %c0_40] : memref<8x4xf32, #tpu.memory_space<vmem>>, vector<8x4xf32>
    %c0_41 = arith.constant 0 : index
    %c0_42 = arith.constant 0 : index
    %211 = vector.load %arg9[%c0_41, %c0_42] : memref<8x1xf32, #tpu.memory_space<vmem>>, vector<8x1xf32>
    %212 = vector.shape_cast %211 : vector<8x1xf32> to vector<8x1xf32>
    %213 = vector.broadcast %212 : vector<8x1xf32> to vector<8x256xf32>
    %214 = vector.extract_strided_slice %210 {offsets = [0, 0], sizes = [8, 1], strides = [1, 1]} : vector<8x4xf32> to vector<8x1xf32>
    %215 = vector.extract_strided_slice %116 {offsets = [0, 0], sizes = [1, 256], strides = [1, 1]} : vector<2x256xf32> to vector<1x256xf32>
    %216 = vector.broadcast %214 : vector<8x1xf32> to vector<8x256xf32>
    %217 = vector.broadcast %215 : vector<1x256xf32> to vector<8x256xf32>
    %218 = arith.mulf %216, %217 : vector<8x256xf32>
    %219 = arith.addf %213, %218 : vector<8x256xf32>
    %220 = vector.extract_strided_slice %210 {offsets = [0, 1], sizes = [8, 1], strides = [1, 1]} : vector<8x4xf32> to vector<8x1xf32>
    %221 = vector.extract_strided_slice %116 {offsets = [1, 0], sizes = [1, 256], strides = [1, 1]} : vector<2x256xf32> to vector<1x256xf32>
    %222 = vector.broadcast %220 : vector<8x1xf32> to vector<8x256xf32>
    %223 = vector.broadcast %221 : vector<1x256xf32> to vector<8x256xf32>
    %224 = arith.mulf %222, %223 : vector<8x256xf32>
    %225 = arith.addf %219, %224 : vector<8x256xf32>
    %226 = vector.extract_strided_slice %210 {offsets = [0, 2], sizes = [8, 1], strides = [1, 1]} : vector<8x4xf32> to vector<8x1xf32>
    %227 = vector.extract_strided_slice %209 {offsets = [0, 0], sizes = [1, 256], strides = [1, 1]} : vector<2x256xf32> to vector<1x256xf32>
    %228 = vector.broadcast %226 : vector<8x1xf32> to vector<8x256xf32>
    %229 = vector.broadcast %227 : vector<1x256xf32> to vector<8x256xf32>
    %230 = arith.mulf %228, %229 : vector<8x256xf32>
    %231 = arith.addf %225, %230 : vector<8x256xf32>
    %232 = vector.extract_strided_slice %210 {offsets = [0, 3], sizes = [8, 1], strides = [1, 1]} : vector<8x4xf32> to vector<8x1xf32>
    %233 = vector.extract_strided_slice %209 {offsets = [1, 0], sizes = [1, 256], strides = [1, 1]} : vector<2x256xf32> to vector<1x256xf32>
    %234 = vector.broadcast %232 : vector<8x1xf32> to vector<8x256xf32>
    %235 = vector.broadcast %233 : vector<1x256xf32> to vector<8x256xf32>
    %236 = arith.mulf %234, %235 : vector<8x256xf32>
    %237 = arith.addf %231, %236 : vector<8x256xf32>
    %cst_43 = arith.constant 0.000000e+00 : f32
    %238 = vector.broadcast %cst_43 : f32 to vector<8x256xf32>
    %239 = arith.subf %238, %237 : vector<8x256xf32>
    %cst_44 = arith.constant 8.000000e+01 : f32
    %240 = vector.broadcast %cst_44 : f32 to vector<8x256xf32>
    %241 = arith.minimumf %239, %240 : vector<8x256xf32>
    %242 = math.exp %241 : vector<8x256xf32>
    %cst_45 = arith.constant 1.000000e+00 : f32
    %243 = vector.broadcast %cst_45 : f32 to vector<8x256xf32>
    %244 = arith.addf %243, %242 : vector<8x256xf32>
    %245 = tpu.reciprocal %244 {approx = true} : vector<8x256xf32> -> vector<8x256xf32>
    %246 = arith.mulf %244, %245 : vector<8x256xf32>
    %cst_46 = arith.constant 2.000000e+00 : f32
    %247 = vector.broadcast %cst_46 : f32 to vector<8x256xf32>
    %248 = arith.subf %247, %246 : vector<8x256xf32>
    %249 = arith.mulf %245, %248 : vector<8x256xf32>
    %250 = arith.mulf %237, %249 : vector<8x256xf32>
    %c0_47 = arith.constant 0 : index
    %c0_48 = arith.constant 0 : index
    %c0_49 = arith.constant 0 : index
    %251 = vector.load %arg10[%c0_47, %c0_48, %c0_49] : memref<1x8x256xf32, #tpu.memory_space<vmem>>, vector<1x8x256xf32>
    %252 = vector.shape_cast %251 : vector<1x8x256xf32> to vector<8x256xf32>
    %253 = vector.shape_cast %250 : vector<8x256xf32> to vector<1x8x256xf32>
    tpu.vector_store %arg10[%c0_47, %c0_48, %c0_49], %253 {strides = array<i32>} : memref<1x8x256xf32, #tpu.memory_space<vmem>>, vector<1x8x256xf32>,
    return
  }
  func.func @transform_0(%arg0: i32) -> (i32, i32, i32) {
    %c0_i32 = arith.constant 0 : i32
    %c0_i32_0 = arith.constant 0 : i32
    %c0_i32_1 = arith.constant 0 : i32
    return %arg0, %c0_i32, %c0_i32_0 : i32, i32, i32
  }
  func.func @transform_1(%arg0: i32) -> (i32, i32) {
    %c0_i32 = arith.constant 0 : i32
    %c0_i32_0 = arith.constant 0 : i32
    %c0_i32_1 = arith.constant 0 : i32
    return %c0_i32, %c0_i32_0 : i32, i32
  }
  func.func @transform_2(%arg0: i32) -> (i32, i32) {
    %c0_i32 = arith.constant 0 : i32
    %c0_i32_0 = arith.constant 0 : i32
    %c0_i32_1 = arith.constant 0 : i32
    return %c0_i32, %c0_i32_0 : i32, i32
  }
  func.func @transform_3(%arg0: i32) -> (i32, i32) {
    %c0_i32 = arith.constant 0 : i32
    %c0_i32_0 = arith.constant 0 : i32
    %c0_i32_1 = arith.constant 0 : i32
    return %c0_i32, %c0_i32_0 : i32, i32
  }
  func.func @transform_4(%arg0: i32) -> (i32, i32) {
    %c0_i32 = arith.constant 0 : i32
    %c0_i32_0 = arith.constant 0 : i32
    %c0_i32_1 = arith.constant 0 : i32
    return %c0_i32, %c0_i32_0 : i32, i32
  }
  func.func @transform_5(%arg0: i32) -> (i32, i32) {
    %c0_i32 = arith.constant 0 : i32
    %c0_i32_0 = arith.constant 0 : i32
    %c0_i32_1 = arith.constant 0 : i32
    return %c0_i32, %c0_i32_0 : i32, i32
  }
  func.func @transform_6(%arg0: i32) -> (i32, i32) {
    %c0_i32 = arith.constant 0 : i32
    %c0_i32_0 = arith.constant 0 : i32
    %c0_i32_1 = arith.constant 0 : i32
    return %c0_i32, %c0_i32_0 : i32, i32
  }
  func.func @transform_7(%arg0: i32) -> (i32, i32) {
    %c0_i32 = arith.constant 0 : i32
    %c0_i32_0 = arith.constant 0 : i32
    %c0_i32_1 = arith.constant 0 : i32
    return %c0_i32, %c0_i32_0 : i32, i32
  }
  func.func @transform_8(%arg0: i32) -> (i32, i32) {
    %c0_i32 = arith.constant 0 : i32
    %c0_i32_0 = arith.constant 0 : i32
    %c0_i32_1 = arith.constant 0 : i32
    return %c0_i32, %c0_i32_0 : i32, i32
  }
  func.func @transform_9(%arg0: i32) -> (i32, i32, i32) {
    %c0_i32 = arith.constant 0 : i32
    %c0_i32_0 = arith.constant 0 : i32
    %c0_i32_1 = arith.constant 0 : i32
    return %arg0, %c0_i32, %c0_i32_0 : i32, i32, i32
  }
}

</mosaic_0001>

<bundles_post_ra>
// kernel: residual_bottleneck_pallas.1
= control target key start
LH: loop header
LB: loop body
LE: loop exit
PB: predicated region body
PF: predicated region fallthrough
CT: control target
= control target key end

     0   :  { %s1086_s30 = smov 0   ;;  %s1558_s0 = inlined_call_operand.vmem [shape: f32[2,4,256], index: 0, kind: input, shape index: {}]   ;;  %s1559_s1 = inlined_call_operand.vmem [shape: f32[2,9], index: 1, kind: input, shape index: {}]   ;;  %s1560_s2 = inlined_call_operand.vmem [shape: f32[2,1], index: 2, kind: input, shape index: {}]   ;;  %s1561_s3 = inlined_call_operand.vmem [shape: f32[2,2], index: 3, kind: input, shape index: {}]   ;;  %s1562_s4 = inlined_call_operand.vmem [shape: f32[2,1], index: 4, kind: input, shape index: {}]   ;;  %s1563_s5 = inlined_call_operand.vmem [shape: f32[2,9], index: 5, kind: input, shape index: {}]   ;;  %s1564_s6 = inlined_call_operand.vmem [shape: f32[2,1], index: 6, kind: input, shape index: {}]   ;;  %s1565_s7 = inlined_call_operand.vmem [shape: f32[8,4], index: 7, kind: input, shape index: {}]   ;;  %s1566_s8 = inlined_call_operand.vmem [shape: f32[8,1], index: 8, kind: input, shape index: {}]   ;;  %s1567_s9 = inlined_call_operand.vmem [shape: f32[2,8,256], index: 9, kind: output, shape index: {}]  }
   0x1 LB: > { %s914_s10 = sadd.s32 4294967295, %s1016_s30   ;;  %p918_p0 = scmp.ge.s32.totalorder %s1016_s30, 1  ;;  %s1016_s30 = sphi %s1086_s30, %s19_s30  }
   0x2   : > { %p287_p1 = scmp.lt.s32.totalorder %s1016_s30, 3 }
   0x4   : > { %p288_p2 = pnand %p918_p0, %p287_p1 }
   0x5   : > { %p323_p3 = scmp.lt.s32.totalorder (!%p288_p2), %s914_s10, 1  ;;  %s1021_s19 = smov (!%p288_p2), 17  }
   0x6   : > { %291 = sbr.rel (%p288_p2) target bundleno = 443 (0x1bb), region = 56  ;;  %s1022_s22 = smov (!%p288_p2), 16  }
   0x7   : > { %s1023_s23 = smov (!%p288_p2), 15   ;;  %s1025_s24 = smov (!%p288_p2), 1  }
   0x8   : > { %s1029_s27 = smov (!%p288_p2), 127   ;;  %s1030_s28 = smov (!%p288_p2), 113  }
   0x9   : > { %s1032_s29 = smov (!%p288_p2), 112   ;;  %s1033_s11 = smov (!%p288_p2), 111  }
   0xb   : > { %v391_v0 = vld [vmem:[%s1560_s2] sm:$0x3]  ;;  %v1018_v2 = vmov 0   ;;  %s1585_s10 = smov (!%p323_p3, %s914_s10), 1  ;;  %v1019_v3 = vmov 4   ;;  %v1020_v5 = vmov 2   ;;  %v333_v33 = vlaneseq }
   0xc   : > { %v1100_v1 = vld [vmem:[%s1559_s1] sm:$0x3]  ;;  %970 = vset.pattern.permute.xlu1 %v1018_v2  ;;  %969 = vset.pattern.permute.xlu0 %v1018_v2  ;;  %s941_s15 = sshll.u32 %s1585_s10, 3  ;;  %v1024_v13 = vmov 3   ;;  %v1026_v16 = vmov 8   ;;  %v1027_v20 = vmov 1  }
   0xd   : > { %394 = vperm.xlu0 %969, %v391_v0   ;;  %414 = vperm.xlu1 %970, %v1100_v1   ;;  %s1112_s18 = scalar_lea.vmem %s1558_s0, %s941_s15  ;;  %v589_v8 = vld [vmem:[%s1562_s4] sm:$0x3]  ;;  %v1028_v21 = vmov 5   ;;  %v1031_v28 = vmov 6   ;;  %v1034_v31 = vmov 7   ;;  %v1175_v34 = vand.u32 127, %v333_v33 }
   0xe   : > { %973 = vset.pattern.permute.xlu2 %v1019_v3  ;;  %v1115_v4 = vld [vmem:[%s1112_s18] sm:$0x33]  ;;  %v1035_v50 = vmov 0.0   ;;  %s942_s20 = sshll.u32 %s1585_s10, 4 }
   0xf   : > { %398 = vst [vmem:[#allocation1] ss:$2 sm:$0xff] %v1115_v4  ;;  %v588_v17 = vld [vmem:[%s1561_s3] sm:$0x3]  ;;  %v1179_v36 = vadd.s32 128, %v1175_v34  ;;  %v338_v37 = vand.u32 15, %v1175_v34 }
  0x10   : > { %v1166_v30 = vld [vmem:[%s1563_s5] sm:$0x3]  ;;  %v336_v41 = vshra.s32 %v1175_v34, 4  ;;  %vm430_vm0 = vcmp.lt.s32.totalorder %v1175_v34, 16  ;;  %vm407_vm7 = vcmp.lt.s32.totalorder %v1175_v34, 17  ;;  %vm452_vm12 = vcmp.lt.s32.totalorder %v1175_v34, 15 }
  0x11   : > { %v339_v38 = vand.u32 15, %v1179_v36  ;;  %v337_v42 = vshra.s32 %v1179_v36, 4  ;;  %vm1186_vm1 = vcmp.ge.s32.totalorder %v338_v37, 1  ;;  %vm1245_vm8 = vcmp.le.s32.totalorder %v338_v37, 14 }
  0x12   : > { %vm1204_vm3 = vcmp.ge.s32.totalorder %v336_v41, 1  ;;  %vm474_vm13 = vcmp.lt.s32.totalorder %v1175_v34, 1  ;;  %vm509_vm14 = vcmp.lt.s32.totalorder %v1175_v34, 127  ;;  %vm1321_vm15 = vcmp.le.s32.totalorder %v336_v41, 14 }
  0x13   : > { %vm1198_vm2 = vcmp.ge.s32.totalorder %v339_v38, 1  ;;  %vm1211_vm4 = vcmp.ge.s32.totalorder %v337_v42, 1  ;;  %vm344_vm5 = vmand %vm1204_vm3, %vm1186_vm1  ;;  %vm1249_vm9 = vcmp.le.s32.totalorder %v339_v38, 14 }
  0x14   : > { %vm345_vm6 = vmand %vm1211_vm4, %vm1198_vm2  ;;  %v1226_v51 = vsel %vm344_vm5, 1.0, %v1035_v50  ;;  %vm1327_vm5 = vcmp.le.s32.totalorder %v337_v42, 14 }
  0x15   : > { %971 = vset.pattern.permute.xlu1 %v1020_v5  ;;  %v1229_v52 = vsel %vm345_vm6, 1.0, %v1035_v50  ;;  %vm356_vm10 = vmand %vm1204_vm3, %vm1245_vm8 }
  0x16   : > { %v400_v6 = vld.sshfl [vmem:[#allocation1 + $0x8] sm:$0xff pattern:$0x75316420]  ;;  %v399_v7 = vld.sshfl [vmem:[#allocation1] sm:$0xff pattern:$0x75316420]  ;;  %vm357_vm11 = vmand %vm1211_vm4, %vm1249_vm9 }
  0x17   : > { %405 = vrot.lane.b32.xlu1 %v400_v6, %s1021_s19  ;;  %403 = vrot.lane.b32.xlu0 %v399_v7, %s1021_s19  ;;  %421 = vst [vmem:[#allocation1] ss:$2 sm:$0xff] %v1115_v4  ;;  %vm372_vm6 = vmand %vm1321_vm15, %vm1186_vm1 }
  0x18   : > { %v1355_v44 = vsel %vm372_vm6, 1.0, %v1035_v50  ;;  %vm383_vm6 = vmand %vm1327_vm5, %vm1249_vm9 }
  0x1e   : > { %v422_v9 = vld.sshfl [vmem:[#allocation1] sm:$0xff pattern:$0x75316420]  ;;  %v423_v10 = vld.sshfl [vmem:[#allocation1 + $0x8] sm:$0xff pattern:$0x75316420] }
  0x1f   : > { %458 = vperm.xlu1 %971, %v1100_v1   ;;  %426 = vrot.lane.b32.xlu2 %v422_v9, %s1022_s22  ;;  %443 = vst [vmem:[#allocation1] ss:$2 sm:$0xff] %v1115_v4  ;;  %v1268_v9 = vsel %vm357_vm11, 1.0, %v1035_v50  ;;  %vm531_vm11 = vcmp.lt.s32.totalorder %v1175_v34, 113 }
  0x20   : > { %592 = vperm.xlu0 %969, %v589_v8   ;;  %v1265_v8 = vsel %vm356_vm10, 1.0, %v1035_v50  ;;  %vm373_vm10 = vmand %vm1327_vm5, %vm1198_vm2 }
  0x26   : > { %v444_v11 = vld.sshfl [vmem:[#allocation1] sm:$0xff pattern:$0x75316420]  ;;  %v445_v12 = vld.sshfl [vmem:[#allocation1 + $0x8] sm:$0xff pattern:$0x75316420] }
  0x27   : > { %428 = vrot.lane.b32.xlu2 %v423_v10, %s1022_s22  ;;  %448 = vrot.lane.b32.xlu1 %v444_v11, %s1023_s23  ;;  %465 = vst [vmem:[#allocation1] ss:$2 sm:$0xff] %v1115_v4 }
  0x28   : > { %972 = vset.pattern.permute.xlu1 %v1024_v13  ;;  %979 = vset.pattern.permute.xlu0 %v1026_v16 }
  0x2e   : > { %v467_v14 = vld.sshfl [vmem:[#allocation1 + $0x8] sm:$0xff pattern:$0x75316420]  ;;  %v466_v15 = vld.sshfl [vmem:[#allocation1] sm:$0xff pattern:$0x75316420] }
  0x2f   : > { %488 = vperm.xlu2 %973, %v1100_v1   ;;  %480 = vperm.xlu1 %972, %v1100_v1   ;;  %491 = vst [vmem:[#allocation1] ss:$2 sm:$0xff] %v1115_v4 }
  0x30   : > { %472 = vrot.lane.b32.xlu0 %v467_v14, %s1025_s24 }
  0x36   : > { %v1139_v18 = vld.sshfl [vmem:[#allocation1] sm:$0xff pattern:$0x75316420]  ;;  %v1141_v19 = vld.sshfl [vmem:[#allocation1 + $0x8] sm:$0xff pattern:$0x75316420] }
  0x37   : > { %450 = vrot.lane.b32.xlu2 %v445_v12, %s1023_s23  ;;  %977 = vset.pattern.permute.xlu1 %v1027_v20  ;;  %500 = vst [vmem:[#allocation1] ss:$2 sm:$0xff] %v1115_v4 }
  0x38   : > { %612 = vperm.xlu1 %977, %v588_v17   ;;  %974 = vset.pattern.permute.xlu2 %v1028_v21 }
  0x3e   : > { %v501_v22 = vld.sshfl [vmem:[#allocation1] sm:$0xff pattern:$0x75316420]  ;;  %v502_v23 = vld.sshfl [vmem:[#allocation1 + $0x8] sm:$0xff pattern:$0x75316420] }
  0x3f   : > { %470 = vrot.lane.b32.xlu2 %v466_v15, %s1025_s24  ;;  %505 = vrot.lane.b32.xlu0 %v501_v22, %s1029_s27  ;;  %522 = vst [vmem:[#allocation1] ss:$2 sm:$0xff] %v1115_v4  ;;  %v1291_v22 = vsel %vm1198_vm2, 1.0, %v1035_v50  ;;  %vm382_vm2 = vmand %vm1321_vm15, %vm1245_vm8 }
  0x40   : > { %507 = vrot.lane.b32.xlu1 %v502_v23, %s1029_s27 }
  0x41   : > { %980 = vset.pattern.permute.xlu1 %v1018_v2 }
  0x46   : > { %v523_v24 = vld.sshfl [vmem:[#allocation1] sm:$0xff pattern:$0x75316420]  ;;  %v524_v25 = vld.sshfl [vmem:[#allocation1 + $0x8] sm:$0xff pattern:$0x75316420] }
  0x47   : > { %515 = vperm.xlu2 %974, %v1100_v1   ;;  %527 = vrot.lane.b32.xlu0 %v523_v24, %s1030_s28  ;;  %544 = vst [vmem:[#allocation1] ss:$2 sm:$0xff] %v1115_v4 }
  0x48   : > { %529 = vrot.lane.b32.xlu1 %v524_v25, %s1030_s28 }
  0x4e   : > { %v545_v26 = vld.sshfl [vmem:[#allocation1] sm:$0xff pattern:$0x75316420]  ;;  %v546_v27 = vld.sshfl [vmem:[#allocation1 + $0x8] sm:$0xff pattern:$0x75316420] }
  0x4f   : > { %975 = vset.pattern.permute.xlu2 %v1031_v28  ;;  %549 = vrot.lane.b32.xlu0 %v545_v26, %s1032_s29  ;;  %566 = vst [vmem:[#allocation1] ss:$2 sm:$0xff] %v1115_v4 }
  0x50   : > { %537 = vperm.xlu2 %975, %v1100_v1   ;;  %551 = vrot.lane.b32.xlu1 %v546_v27, %s1032_s29 }
  0x56   : > { %v567_v29 = vld.sshfl [vmem:[#allocation1] sm:$0xff pattern:$0x75316420]  ;;  %v568_v32 = vld.sshfl [vmem:[#allocation1 + $0x8] sm:$0xff pattern:$0x75316420] }
  0x57   : > { %581 = vperm.xlu0 %979, %v1100_v1  }
  0x58   : > { %976 = vset.pattern.permute.xlu2 %v1018_v2  ;;  %571 = vrot.lane.b32.xlu1 %v567_v29, %s1033_s11 }
  0x59   : > { %597 = vperm.xlu2 %976, %v588_v17  }
  0x5f   : > { %782 = vperm.xlu0 %979, %v1166_v30  }
  0x61   : > { %978 = vset.pattern.permute.xlu2 %v1034_v31 }
  0x62   : > { %559 = vperm.xlu2 %978, %v1100_v1  }
  0x67   : > { %989 = vset.pattern.permute.xlu0 %v1027_v20 }
  0x68   : > { %436 = vperm.xlu0 %989, %v1100_v1   ;;  %v1399_v1 = vsel %vm382_vm2, 1.0, %v1035_v50 }
  0x6a   : > { %573 = vrot.lane.b32.xlu2 %v568_v32, %s1033_s11 }
  0x6b   : > { %981 = vset.pattern.permute.xlu2 %v1018_v2 }
  0x72   : > { %662 = vperm.xlu2 %981, %v1166_v30  }
  0x79   : > { %v427_v35 = vpop.permute.xlu2 %426 }
  0x7a   : > { %982 = vset.pattern.permute.xlu2 %v1027_v20  ;;  %v1286_v20 = vsel %vm1186_vm1, 1.0, %v1035_v50  ;;  %vm553_vm1 = vcmp.lt.s32.totalorder %v1175_v34, 112 }
  0x7b   : > { %678 = vperm.xlu2 %982, %v1166_v30  }
  0x7f   : > { %v395_v39 = vpop.permute.xlu0 %394  ;;  %v415_v40 = vpop.permute.xlu1 %414 }
  0x81   : > { %v429_v43 = vpop.permute.xlu2 %428 }
  0x82   : > { %v1192_v45 = vsel %vm430_vm0, %v427_v35, %v429_v43  ;;  %v1196_v46 = vsel %vm430_vm0, %v429_v43, %v427_v35  ;;  %v389_v35 = vld [vmem:[%s1112_s18] sm:$0xcc] }
  0x83   : > { %983 = vset.pattern.permute.xlu2 %v1020_v5  ;;  %v601_v43 = vperm.slane %v389_v35, 2 }
  0x84   : > { %694 = vperm.xlu2 %983, %v1166_v30  }
  0x89   : > { %v406_v53 = vpop.permute.xlu1 %405  ;;  %v404_v54 = vpop.permute.xlu0 %403 }
  0x8a   : > { %v408_v55 = vsel %vm407_vm7, %v404_v54, %v406_v53  ;;  %v409_v56 = vsel %vm407_vm7, %v406_v53, %v404_v54  ;;  %v1235_v57 = vpop.permute.xlu2 %488  ;;  %v602_v53 = vperm.slane %v389_v35, 6 }
  0x8b   : > { %v410_v58 = vmul.f32 %v1226_v51, %v409_v56  ;;  %v411_v59 = vmul.f32 %v1229_v52, %v408_v55  ;;  %v605_v56 = vperm.slane %v601_v43, 2 }
  0x8c   : > { %984 = vset.pattern.permute.xlu2 %v1024_v13 }
  0x8d   : > { %v417_v60 = vmul.f32 %v415_v40, %v410_v58  ;;  %v418_v61 = vmul.f32 %v415_v40, %v411_v59  ;;  %710 = vperm.xlu2 %984, %v1166_v30   ;;  %v616_v40 = vperm.slane %v389_v35, 7  ;;  %v606_v58 = vperm.slane %v602_v53, 2  ;;  %v646_v59 = vld [vmem:[%s1564_s6] sm:$0x3] }
  0x8e   : > { %649 = vperm.xlu1 %980, %v646_v59  }
  0x8f   : > { %v1241_v62 = vadd.f32 %v417_v60, %v395_v39  ;;  %v1243_v63 = vadd.f32 %v418_v61, %v395_v39  ;;  %v615_v39 = vperm.slane %v389_v35, 3  ;;  %v620_v55 = vperm.slane %v616_v40, 3 }
  0x90   : > { %v1317_v60 = vsel %vm1249_vm9, 1.0, %v1035_v50 }
  0x91   : > { %v459_v0 = vpop.permute.xlu1 %458  ;;  %v619_v54 = vperm.slane %v615_v39, 3 }
  0x92   : > { %v451_v4 = vpop.permute.xlu2 %450  ;;  %v593_v7 = vpop.permute.xlu0 %592 }
  0x95   : > { %985 = vset.pattern.permute.xlu2 %v1019_v3 }
  0x96   : > { %718 = vperm.xlu2 %985, %v1166_v30  }
  0x99   : > { %v449_v10 = vpop.permute.xlu1 %448 }
  0x9a   : > { %v453_v3 = vsel %vm452_vm12, %v449_v10, %v451_v4  ;;  %v454_v11 = vsel %vm452_vm12, %v451_v4, %v449_v10  ;;  %v471_v12 = vpop.permute.xlu2 %470  ;;  %v1402_v4 = vsel %vm383_vm6, 1.0, %v1035_v50 }
  0x9b   : > { %v455_v14 = vmul.f32 %v1265_v8, %v454_v11  ;;  %v456_v15 = vmul.f32 %v1268_v9, %v453_v3 }
  0x9d   : > { %v1276_v16 = vmul.f32 %v459_v0, %v455_v14  ;;  %v1278_v17 = vmul.f32 %v459_v0, %v456_v15 }
  0x9e   : > { %986 = vset.pattern.permute.xlu2 %v1028_v21 }
  0x9f   : > { %734 = vperm.xlu2 %986, %v1166_v30  }
  0xa1   : > { %v481_v23 = vpop.permute.xlu1 %480 }
  0xa2   : > { %v473_v24 = vpop.permute.xlu0 %472  ;;  %v516_v25 = vpop.permute.xlu2 %515 }
  0xa3   : > { %v475_v21 = vsel %vm474_vm13, %v471_v12, %v473_v24  ;;  %v476_v26 = vsel %vm474_vm13, %v473_v24, %v471_v12 }
  0xa4   : > { %v477_v27 = vmul.f32 %v1286_v20, %v476_v26  ;;  %v478_v29 = vmul.f32 %v1291_v22, %v475_v21 }
  0xa6   : > { %v1299_v32 = vmul.f32 %v481_v23, %v477_v27  ;;  %v1301_v33 = vmul.f32 %v481_v23, %v478_v29 }
  0xa7   : > { %987 = vset.pattern.permute.xlu2 %v1031_v28  ;;  %v1312_v28 = vsel %vm1245_vm8, 1.0, %v1035_v50 }
  0xaa   : > { %v613_v37 = vpop.permute.xlu1 %612  ;;  %v538_v38 = vpop.permute.xlu2 %537 }
  0xab   : > { %v621_v3 = vmul.f32 %v619_v54, %v613_v37  ;;  %v622_v11 = vmul.f32 %v620_v55, %v613_v37  ;;  %v1358_v37 = vsel %vm373_vm10, 1.0, %v1035_v50  ;;  %vm575_vm10 = vcmp.lt.s32.totalorder %v1175_v34, 111 }
  0xb1   : > { %v506_v61 = vpop.permute.xlu0 %505 }
  0xb2   : > { %v508_v0 = vpop.permute.xlu1 %507 }
  0xb3   : > { %v510_v12 = vsel %vm509_vm14, %v506_v61, %v508_v0  ;;  %v511_v14 = vsel %vm509_vm14, %v508_v0, %v506_v61  ;;  %v598_v15 = vpop.permute.xlu2 %597 }
  0xb4   : > { %v512_v41 = vmul.f32 %v1312_v28, %v510_v12  ;;  %v513_v23 = vmul.f32 %v1317_v60, %v511_v14  ;;  %v607_v24 = vmul.f32 %v605_v56, %v598_v15  ;;  %v608_v21 = vmul.f32 %v606_v58, %v598_v15 }
  0xb5   : > { %v1375_v14 = vsel %vm1321_vm15, 1.0, %v1035_v50  ;;  %v1380_v15 = vsel %vm1327_vm5, 1.0, %v1035_v50 }
  0xb6   : > { %v1341_v36 = vmul.f32 %v516_v25, %v512_v41  ;;  %v1343_v42 = vmul.f32 %v516_v25, %v513_v23  ;;  %v609_v26 = vadd.f32 %v607_v24, %v593_v7  ;;  %v610_v27 = vadd.f32 %v608_v21, %v593_v7 }
  0xb8   : > { %v1349_v29 = vadd.f32 %v621_v3, %v609_v26  ;;  %v1351_v35 = vadd.f32 %v622_v11, %v610_v27 }
  0xb9   : > { %v528_v25 = vpop.permute.xlu0 %527 }
  0xba   : > { %v625_v7 = vsub.f32 0.0, %v1349_v29  ;;  %v626_v47 = vsub.f32 0.0, %v1351_v35  ;;  %v530_v39 = vpop.permute.xlu1 %529 }
  0xbb   : > { %v532_v40 = vsel %vm531_vm11, %v528_v25, %v530_v39  ;;  %v533_v43 = vsel %vm531_vm11, %v530_v39, %v528_v25 }
  0xbc   : > { %v627_v53 = vmin.f32 %v625_v7, 80.0  ;;  %v628_v54 = vmin.f32 %v626_v47, 80.0  ;;  %v534_v55 = vmul.f32 %v1355_v44, %v532_v40  ;;  %v535_v56 = vmul.f32 %v1358_v37, %v533_v43  ;;  %v560_v3 = vpop.permute.xlu2 %559 }
  0xbe   : > { %v629_v58 = vmul.f32 1.442695, %v627_v53  ;;  %v631_v59 = vmul.f32 1.442695, %v628_v54  ;;  %v1368_v61 = vmul.f32 %v538_v38, %v534_v55  ;;  %v1370_v0 = vmul.f32 %v538_v38, %v535_v56 }
  0xc0   : > { %994 = vpow2.f32 %v629_v58 }
  0xc1   : > { %996 = vpow2.f32 %v631_v59  ;;  %v550_v11 = vpop.permute.xlu0 %549 }
  0xc2   : > { %v552_v12 = vpop.permute.xlu1 %551 }
  0xc3   : > { %v554_v38 = vsel %vm553_vm1, %v550_v11, %v552_v12  ;;  %v555_v41 = vsel %vm553_vm1, %v552_v12, %v550_v11 }
  0xc4   : > { %v556_v23 = vmul.f32 %v1375_v14, %v554_v38  ;;  %v557_v24 = vmul.f32 %v1380_v15, %v555_v41  ;;  %v574_v6 = vpop.permute.xlu2 %573 }
  0xc6   : > { %v995_v21 = vpop.eup %994  ;;  %v562_v25 = vmul.f32 %v560_v3, %v556_v23  ;;  %v563_v7 = vmul.f32 %v560_v3, %v557_v24 }
  0xc7   : > { %v997_v26 = vpop.eup %996  ;;  %v633_v27 = vadd.f32 1.0, %v995_v21  ;;  %v1415_v21 = vsel %vm1204_vm3, 1.0, %v1035_v50 }
  0xc8   : > { %v634_v47 = vadd.f32 1.0, %v997_v26  ;;  %v1420_v26 = vsel %vm1211_vm4, 1.0, %v1035_v50  ;;  %v433_v48 = vmul.f32 %v1415_v21, %v1196_v46  ;;  %v497_v46 = vmul.f32 %v1141_v19, %v1235_v57 }
  0xc9   : > { %998 = vrcp.f32 %v633_v27  ;;  %v582_v39 = vpop.permute.xlu0 %581  ;;  %v434_v49 = vmul.f32 %v1420_v26, %v1192_v45  ;;  %v496_v45 = vmul.f32 %v1139_v18, %v1235_v57 }
  0xca   : > { %1000 = vrcp.f32 %v634_v47  ;;  %v572_v40 = vpop.permute.xlu1 %571 }
  0xcb   : > { %v576_v10 = vsel %vm575_vm10, %v572_v40, %v574_v6  ;;  %v577_v43 = vsel %vm575_vm10, %v574_v6, %v572_v40 }
  0xcc   : > { %v578_v53 = vmul.f32 %v1399_v1, %v576_v10  ;;  %v579_v54 = vmul.f32 %v1402_v4, %v577_v43 }
  0xce   : > { %v584_v55 = vmul.f32 %v582_v39, %v578_v53  ;;  %v585_v56 = vmul.f32 %v582_v39, %v579_v54 }
  0xcf   : > { %v999_v58 = vpop.eup %998 }
  0xd0   : > { %v1001_v59 = vpop.eup %1000  ;;  %v637_v3 = vmul.f32 %v999_v58, %v633_v27 }
  0xd1   : > { %v638_v11 = vmul.f32 %v1001_v59, %v634_v47  ;;  %v1410_v12 = vpop.permute.xlu0 %782 }
  0xd2   : > { %v639_v38 = vsub.f32 2.0, %v637_v3 }
  0xd3   : > { %v640_v41 = vsub.f32 2.0, %v638_v11 }
  0xd4   : > { %v641_v23 = vmul.f32 %v999_v58, %v639_v38 }
  0xd5   : > { %v642_v24 = vmul.f32 %v1001_v59, %v640_v41 }
  0xd6   : > { %v1423_v39 = vmul.f32 %v641_v23, %v1349_v29 }
  0xd7   : > { %v1426_v27 = vmul.f32 %v642_v24, %v1351_v35 }
  0xd8   : > { %669 = vrot.lane.b32.xlu0 %v1423_v39, %s1022_s22  ;;  %652 = vrot.lane.b32.xlu2 %v1423_v39, %s1021_s19 }
  0xd9   : > { %654 = vrot.lane.b32.xlu1 %v1426_v27, %s1021_s19 }
  0xda   : > { %v437_v50 = vpop.permute.xlu0 %436 }
  0xdb   : > { %v439_v29 = vmul.f32 %v437_v50, %v433_v48  ;;  %v440_v47 = vmul.f32 %v437_v50, %v434_v49 }
  0xdd   : > { %v441_v35 = vadd.f32 %v439_v29, %v1241_v62  ;;  %v442_v6 = vadd.f32 %v440_v47, %v1243_v63 }
  0xdf   : > { %v463_v40 = vadd.f32 %v1276_v16, %v441_v35  ;;  %v464_v10 = vadd.f32 %v1278_v17, %v442_v6 }
  0xe0   : > { %685 = vrot.lane.b32.xlu0 %v1423_v39, %s1023_s23  ;;  %750 = vperm.xlu2 %987, %v1166_v30  }
  0xe1   : > { %v485_v43 = vadd.f32 %v1299_v32, %v463_v40  ;;  %v486_v62 = vadd.f32 %v1301_v33, %v464_v10  ;;  %671 = vrot.lane.b32.xlu1 %v1426_v27, %s1022_s22 }
  0xe3   : > { %v498_v63 = vadd.f32 %v496_v45, %v485_v43  ;;  %v499_v16 = vadd.f32 %v497_v46, %v486_v62 }
  0xe5   : > { %v521_v17 = vadd.f32 %v1343_v42, %v499_v16  ;;  %v520_v53 = vadd.f32 %v1341_v36, %v498_v63 }
  0xe7   : > { %v543_v54 = vadd.f32 %v1370_v0, %v521_v17  ;;  %v542_v18 = vadd.f32 %v1368_v61, %v520_v53 }
  0xe8   : > { %701 = vrot.lane.b32.xlu0 %v1423_v39, %s1025_s24  ;;  %988 = vset.pattern.permute.xlu2 %v1034_v31  ;;  %v663_v31 = vpop.permute.xlu2 %662 }
  0xe9   : > { %687 = vrot.lane.b32.xlu1 %v1426_v27, %s1023_s23  ;;  %766 = vperm.xlu2 %988, %v1166_v30   ;;  %v565_v19 = vadd.f32 %v563_v7, %v543_v54  ;;  %v564_v57 = vadd.f32 %v562_v25, %v542_v18  ;;  %v790_v30 = vld [vmem:[%s1566_s8] sm:$0xff]  ;;  %s332_s23 = scalar_lea.vmem %s1567_s9, %s942_s20 }
  0xeb   : > { %v1463_v32 = vadd.f32 %v584_v55, %v564_v57  ;;  %v1465_v33 = vadd.f32 %v585_v56, %v565_v19 }
  0xed   : > { %v801_v34 = vperm.slane %v1463_v32, 0 }
  0xf0   : > { %725 = vrot.lane.b32.xlu0 %v1423_v39, %s1029_s27  ;;  %v679_v36 = vpop.permute.xlu2 %678 }
  0xf1   : > { %703 = vrot.lane.b32.xlu1 %v1426_v27, %s1025_s24  ;;  %990 = vset.pattern.permute.xlu2 %v1018_v2  ;;  %v789_v2 = vld [vmem:[%s1565_s7] sm:$0xff] }
  0xf2   : > { %793 = vperm.xlu2 %990, %v790_v30  }
  0xf8   : > { %741 = vrot.lane.b32.xlu0 %v1423_v39, %s1030_s28  ;;  %v695_v61 = vpop.permute.xlu2 %694 }
  0xf9   : > { %727 = vrot.lane.b32.xlu1 %v1426_v27, %s1029_s27 }
  0xfa   : > { %992 = vset.pattern.permute.xlu2 %v1024_v13 }
  0xfb   : > { %828 = vperm.xlu2 %992, %v789_v2  }
 0x100   : > { %757 = vrot.lane.b32.xlu0 %v1423_v39, %s1032_s29  ;;  %v650_v42 = vpop.permute.xlu1 %649  ;;  %v711_v7 = vpop.permute.xlu2 %710 }
 0x101   : > { %743 = vrot.lane.b32.xlu1 %v1426_v27, %s1030_s28 }
 0x108   : > { %773 = vrot.lane.b32.xlu0 %v1423_v39, %s1033_s11  ;;  %v719_v58 = vpop.permute.xlu2 %718 }
 0x109   : > { %759 = vrot.lane.b32.xlu1 %v1426_v27, %s1032_s29 }
 0x110   : > { %808 = vperm.xlu0 %989, %v789_v2   ;;  %v735_v11 = vpop.permute.xlu2 %734 }
 0x111   : > { %775 = vrot.lane.b32.xlu1 %v1426_v27, %s1033_s11 }
 0x118   : > { %993 = vset.pattern.permute.xlu0 %v1024_v13 }
 0x119   : > { %798 = vperm.xlu1 %980, %v789_v2  }
 0x121   : > { %991 = vset.pattern.permute.xlu1 %v1020_v5 }
 0x122   : > { %818 = vperm.xlu1 %991, %v789_v2  }
 0x132   : > { %v653_v13 = vpop.permute.xlu2 %652 }
 0x14a   : > { %v670_v0 = vpop.permute.xlu0 %669 }
 0x14b   : > { %v655_v25 = vpop.permute.xlu1 %654 }
 0x14c   : > { %v656_v5 = vsel %vm407_vm7, %v653_v13, %v655_v25  ;;  %v657_v24 = vsel %vm407_vm7, %v655_v25, %v653_v13 }
 0x14d   : > { %v658_v50 = vmul.f32 %v1226_v51, %v657_v24  ;;  %v659_v29 = vmul.f32 %v1229_v52, %v656_v5  ;;  %v722_v5 = vmul.f32 %v719_v58, %v1426_v27 }
 0x14f   : > { %v665_v51 = vmul.f32 %v663_v31, %v658_v50  ;;  %v666_v43 = vmul.f32 %v663_v31, %v659_v29 }
 0x151   : > { %v667_v54 = vadd.f32 %v665_v51, %v650_v42  ;;  %v668_v18 = vadd.f32 %v666_v43, %v650_v42 }
 0x152   : > { %v686_v55 = vpop.permute.xlu0 %685 }
 0x153   : > { %v672_v56 = vpop.permute.xlu1 %671 }
 0x154   : > { %v673_v48 = vsel %vm430_vm0, %v670_v0, %v672_v56  ;;  %v674_v49 = vsel %vm430_vm0, %v672_v56, %v670_v0 }
 0x155   : > { %v675_v40 = vmul.f32 %v1415_v21, %v674_v49  ;;  %v676_v10 = vmul.f32 %v1420_v26, %v673_v48  ;;  %v751_v26 = vpop.permute.xlu2 %750 }
 0x157   : > { %v681_v16 = vmul.f32 %v679_v36, %v675_v40  ;;  %v682_v17 = vmul.f32 %v679_v36, %v676_v10 }
 0x159   : > { %v683_v2 = vadd.f32 %v681_v16, %v667_v54 }
 0x15a   : > { %v702_v59 = vpop.permute.xlu0 %701 }
 0x15b   : > { %v688_v3 = vpop.permute.xlu1 %687 }
 0x15c   : > { %v689_v35 = vsel %vm452_vm12, %v686_v55, %v688_v3  ;;  %v690_v6 = vsel %vm452_vm12, %v688_v3, %v686_v55 }
 0x15d   : > { %v691_v52 = vmul.f32 %v1265_v8, %v690_v6  ;;  %v692_v62 = vmul.f32 %v1268_v9, %v689_v35  ;;  %v684_v9 = vadd.f32 %v682_v17, %v668_v18  ;;  %v767_v49 = vpop.permute.xlu2 %766  ;;  %v802_v17 = vperm.slane %v1465_v33, 0 }
 0x15f   : > { %v697_v19 = vmul.f32 %v695_v61, %v691_v52  ;;  %v698_v57 = vmul.f32 %v695_v61, %v692_v62 }
 0x161   : > { %v699_v42 = vadd.f32 %v697_v19, %v683_v2  ;;  %v700_v25 = vadd.f32 %v698_v57, %v684_v9 }
 0x162   : > { %v726_v41 = vpop.permute.xlu0 %725 }
 0x163   : > { %v704_v38 = vpop.permute.xlu1 %703 }
 0x164   : > { %v705_v45 = vsel %vm474_vm13, %v702_v59, %v704_v38  ;;  %v706_v46 = vsel %vm474_vm13, %v704_v38, %v702_v59 }
 0x165   : > { %v707_v53 = vmul.f32 %v1286_v20, %v706_v46  ;;  %v708_v21 = vmul.f32 %v1291_v22, %v705_v45  ;;  %v794_v16 = vpop.permute.xlu2 %793 }
 0x167   : > { %v713_v31 = vmul.f32 %v711_v7, %v707_v53  ;;  %v714_v0 = vmul.f32 %v711_v7, %v708_v21 }
 0x169   : > { %v715_v3 = vadd.f32 %v713_v31, %v699_v42  ;;  %v716_v38 = vadd.f32 %v714_v0, %v700_v25 }
 0x16a   : > { %v742_v47 = vpop.permute.xlu0 %741 }
 0x16b   : > { %v728_v23 = vpop.permute.xlu1 %727  ;;  %v724_v29 = vadd.f32 %v722_v5, %v716_v38 }
 0x16c   : > { %v729_v30 = vsel %vm509_vm14, %v726_v41, %v728_v23  ;;  %v730_v8 = vsel %vm509_vm14, %v728_v23, %v726_v41  ;;  %v721_v23 = vmul.f32 %v719_v58, %v1423_v39 }
 0x16d   : > { %v731_v61 = vmul.f32 %v1312_v28, %v729_v30  ;;  %v732_v55 = vmul.f32 %v1317_v60, %v730_v8  ;;  %v829_v31 = vpop.permute.xlu2 %828 }
 0x16e   : > { %v723_v50 = vadd.f32 %v721_v23, %v715_v3 }
 0x16f   : > { %v737_v28 = vmul.f32 %v735_v11, %v731_v61  ;;  %v738_v24 = vmul.f32 %v735_v11, %v732_v55 }
 0x171   : > { %v739_v6 = vadd.f32 %v737_v28, %v723_v50  ;;  %v740_v40 = vadd.f32 %v738_v24, %v724_v29 }
 0x172   : > { %v758_v36 = vpop.permute.xlu0 %757 }
 0x173   : > { %v744_v63 = vpop.permute.xlu1 %743 }
 0x174   : > { %v745_v20 = vsel %vm531_vm11, %v742_v47, %v744_v63  ;;  %v746_v22 = vsel %vm531_vm11, %v744_v63, %v742_v47 }
 0x175   : > { %v747_v41 = vmul.f32 %v1355_v44, %v745_v20  ;;  %v748_v13 = vmul.f32 %v1358_v37, %v746_v22 }
 0x177   : > { %v753_v47 = vmul.f32 %v751_v26, %v747_v41  ;;  %v754_v35 = vmul.f32 %v751_v26, %v748_v13 }
 0x179   : > { %v756_v58 = vadd.f32 %v754_v35, %v740_v40 }
 0x17a   : > { %v774_v44 = vpop.permute.xlu0 %773 }
 0x17b   : > { %v760_v56 = vpop.permute.xlu1 %759 }
 0x17c   : > { %v761_v59 = vsel %vm553_vm1, %v758_v36, %v760_v56  ;;  %v762_v7 = vsel %vm553_vm1, %v760_v56, %v758_v36 }
 0x17d   : > { %v763_v60 = vmul.f32 %v1375_v14, %v761_v59  ;;  %v764_v48 = vmul.f32 %v1380_v15, %v762_v7  ;;  %v755_v14 = vadd.f32 %v753_v47, %v739_v6 }
 0x17f   : > { %v769_v10 = vmul.f32 %v767_v49, %v763_v60  ;;  %v770_v37 = vmul.f32 %v767_v49, %v764_v48 }
 0x181   : > { %v771_v46 = vadd.f32 %v769_v10, %v755_v14  ;;  %v772_v51 = vadd.f32 %v770_v37, %v756_v58 }
 0x182   : > { %v809_v54 = vpop.permute.xlu0 %808 }
 0x183   : > { %v776_v45 = vpop.permute.xlu1 %775 }
 0x184   : > { %v777_v39 = vsel %vm575_vm10, %v774_v44, %v776_v45  ;;  %v778_v27 = vsel %vm575_vm10, %v776_v45, %v774_v44 }
 0x185   : > { %v779_v15 = vmul.f32 %v1399_v1, %v777_v39  ;;  %v780_v11 = vmul.f32 %v1402_v4, %v778_v27  ;;  %v811_v1 = vperm.slane %v1463_v32, 1  ;;  %v812_v4 = vperm.slane %v1465_v33, 1 }
 0x187   : > { %v785_v43 = vmul.f32 %v1410_v12, %v779_v15  ;;  %v786_v52 = vmul.f32 %v1410_v12, %v780_v11  ;;  %v813_v57 = vmul.f32 %v811_v1, %v809_v54  ;;  %v814_v30 = vmul.f32 %v812_v4, %v809_v54 }
 0x189   : > { %v787_v62 = vadd.f32 %v785_v43, %v771_v46  ;;  %v788_v63 = vadd.f32 %v786_v52, %v772_v51 }
 0x18b   : > { %v799_v53 = vpop.permute.xlu1 %798  ;;  %v831_v12 = vperm.slane %v787_v62, 1  ;;  %v832_v8 = vperm.slane %v788_v63, 1  ;;  %v821_v2 = vperm.slane %v787_v62, 0  ;;  %v822_v9 = vperm.slane %v788_v63, 0 }
 0x18c   : > { %v803_v21 = vmul.f32 %v801_v34, %v799_v53  ;;  %v804_v26 = vmul.f32 %v802_v17, %v799_v53 }
 0x18d   : > { %v833_v25 = vmul.f32 %v831_v12, %v829_v31  ;;  %v834_v61 = vmul.f32 %v832_v8, %v829_v31 }
 0x18e   : > { %v805_v18 = vadd.f32 %v803_v21, %v794_v16  ;;  %v806_v19 = vadd.f32 %v804_v26, %v794_v16 }
 0x190   : > { %v816_v36 = vadd.f32 %v814_v30, %v806_v19  ;;  %v815_v20 = vadd.f32 %v813_v57, %v805_v18 }
 0x194   : > { %v819_v0 = vpop.permute.xlu1 %818 }
 0x195   : > { %v823_v22 = vmul.f32 %v821_v2, %v819_v0  ;;  %v824_v42 = vmul.f32 %v822_v9, %v819_v0 }
 0x197   : > { %v825_v55 = vadd.f32 %v823_v22, %v815_v20  ;;  %v826_v32 = vadd.f32 %v824_v42, %v816_v36 }
 0x199   : > { %v835_v56 = vadd.f32 %v833_v25, %v825_v55  ;;  %v836_v33 = vadd.f32 %v834_v61, %v826_v32 }
 0x19b   : > { %v837_v59 = vsub.f32 0.0, %v835_v56  ;;  %v838_v7 = vsub.f32 0.0, %v836_v33 }
 0x19d   : > { %v839_v3 = vmin.f32 %v837_v59, 80.0  ;;  %v840_v38 = vmin.f32 %v838_v7, 80.0 }
 0x19f   : > { %v841_v41 = vmul.f32 1.442695, %v839_v3  ;;  %v843_v13 = vmul.f32 1.442695, %v840_v38 }
 0x1a1   : > { %1002 = vpow2.f32 %v841_v41 }
 0x1a2   : > { %1004 = vpow2.f32 %v843_v13 }
 0x1a7   : > { %v1003_v23 = vpop.eup %1002 }
 0x1a8   : > { %v1005_v5 = vpop.eup %1004  ;;  %v845_v28 = vadd.f32 1.0, %v1003_v23 }
 0x1a9   : > { %v846_v24 = vadd.f32 1.0, %v1005_v5 }
 0x1aa   : > { %1006 = vrcp.f32 %v845_v28 }
 0x1ab   : > { %1008 = vrcp.f32 %v846_v24 }
 0x1b0   : > { %v1007_v60 = vpop.eup %1006 }
 0x1b1   : > { %v1009_v48 = vpop.eup %1008  ;;  %v849_v49 = vmul.f32 %v1007_v60, %v845_v28 }
 0x1b2   : > { %v850_v50 = vmul.f32 %v1009_v48, %v846_v24 }
 0x1b3   : > { %v851_v29 = vsub.f32 2.0, %v849_v49 }
 0x1b4   : > { %v852_v47 = vsub.f32 2.0, %v850_v50 }
 0x1b5   : > { %v853_v35 = vmul.f32 %v1007_v60, %v851_v29 }
 0x1b6   : > { %v854_v6 = vmul.f32 %v1009_v48, %v852_v47 }
 0x1b7   : > { %v855_v40 = vmul.f32 %v853_v35, %v835_v56 }
 0x1b8   : > { %v856_v44 = vmul.f32 %v854_v6, %v836_v33 }
 0x1b9   : > { %857 = vst [vmem:[%s332_s23] sm:$0xff] %v855_v40 }
 0x1ba   : > { %858 = vst [vmem:[%s332_s23 + $0x8] sm:$0xff] %v856_v44 }
 0x1bb PF: > { %s19_s30 = sadd.s32 1, %s1016_s30  }
 0x1bc   : > { %p16_p4 = scmp.ge.s32.totalorder %s19_s30, 4  }
 0x1be   :  { %18 = sbr.rel (!%p16_p4) target bundleno = 1 (0x1), region = 86 }

</bundles_post_ra>
